<compile_context>
chip_gen: v5e
topology: v5e:2x2
jax: 0.10.0
libtpu: 0.0.40
codegen_flags: <defaults>
</compile_context>

<pallas_src>
import functools

import jax
import jax.numpy as jnp
from jax.experimental import pallas as pl
from jax.experimental.pallas import tpu as pltpu


def _shifted_flat(m, s, hw):
    """out[:, i] = m[:, i + s], zero-filled where i + s falls outside [0, hw)."""
    if s == 0:
        return m
    if s > 0:
        return jnp.concatenate([m[:, s:], jnp.zeros((1, s), m.dtype)], axis=1)
    return jnp.concatenate([jnp.zeros((1, -s), m.dtype), m[:, :hw + s]], axis=1)


def _spatial_attention_kernel(x_ref, w_ref, o_ref, sum_ref, max_ref, *, H, W):
    # x_ref:   (1, C_TILE, H*W) VMEM  (lane-dense: spatial on the lane axis)
    # w_ref:   (19,)            SMEM  [avg taps * (1/C) | max taps | bias]
    # o_ref:   (1, 1, H*W)      VMEM  (same block across the C-tile axis)
    # sum_ref, max_ref: (1, H*W) f32 VMEM scratch accumulators
    hw = H * W
    c_idx = pl.program_id(1)
    n_c = pl.num_programs(1)

    x = x_ref[0].astype(jnp.float32)                      # (C_TILE, HW)

    @pl.when(c_idx == 0)
    def _init():
        sum_ref[...] = jnp.zeros_like(sum_ref)
        max_ref[...] = jnp.full_like(max_ref, -jnp.inf)

    # Lane-dense channel reduction (accumulated across C tiles in f32).
    sum_ref[...] = sum_ref[...] + jnp.sum(x, axis=0, keepdims=True)
    max_ref[...] = jnp.maximum(max_ref[...], jnp.max(x, axis=0, keepdims=True))

    @pl.when(c_idx == n_c - 1)
    def _finalize():
        # 1/C is folded into the avg-branch weights, so the raw sum is used.
        maps = (sum_ref[...], max_ref[...])                # (1, HW) each
        idx = jax.lax.broadcasted_iota(jnp.int32, (1, hw), 1)
        col = idx % W

        acc = None
        for ch in range(2):
            m = maps[ch]
            for di in range(3):
                for dj in range(3):
                    dc = dj - 1
                    s = (di - 1) * W + dc                  # flat shift for this tap
                    t = _shifted_flat(m, s, hw)            # vertical zero-pad handled
                    if dc == -1:                           # horizontal zero-pad masks
                        t = jnp.where(col >= 1, t, 0.0)
                    elif dc == 1:
                        t = jnp.where(col <= W - 2, t, 0.0)
                    term = w_ref[ch * 9 + di * 3 + dj] * t
                    acc = term if acc is None else acc + term

        o_ref[0] = jax.nn.sigmoid(acc + w_ref[18]).astype(o_ref.dtype)


def _pick_c_tile(C, hw, itemsize, budget_bytes=4 * 1024 * 1024):
    """Largest channel tile whose block fits the per-buffer VMEM budget."""
    if C * hw * itemsize <= budget_bytes:
        return C
    limit = max(8, (budget_bytes // (hw * itemsize)) // 8 * 8)
    t = min(limit, (C // 8) * 8)
    while t >= 8:
        if C % t == 0:
            return t
        t -= 8
    return C  # fallback: whole-C block (may require a larger vmem limit)


def spatial_attention(x, w3, b3, w1, b1):
    """x: (N, C, H, W); w3: (1,2,3,3); b3: (1,); w1: (1,2,1,1); b1: (1,)."""
    N, C, H, W = x.shape
    hw = H * W

    # Fuse RepVGG 3x3 + 1x1 branches into one effective 3x3 conv; fold the 1/C
    # of the channel mean into the avg-branch weights (channel 0).
    w_eff = w3.at[:, :, 1, 1].add(w1[:, :, 0, 0])[0].astype(jnp.float32)  # (2,3,3)
    w_eff = w_eff * jnp.array([1.0 / C, 1.0], jnp.float32).reshape(2, 1, 1)
    b_eff = (b3 + b1).reshape(1).astype(jnp.float32)
    w_flat = jnp.concatenate([w_eff.reshape(18), b_eff])                  # (19,)

    # Lane-dense layouts (free reshapes in HBM layout terms).
    x_flat = x.reshape(N, C, hw)

    c_tile = _pick_c_tile(C, hw, x.dtype.itemsize)
    n_c = C // c_tile

    out_flat = pl.pallas_call(
        functools.partial(_spatial_attention_kernel, H=H, W=W),
        out_shape=jax.ShapeDtypeStruct((N, 1, hw), x.dtype),
        grid_spec=pltpu.PrefetchScalarGridSpec(
            num_scalar_prefetch=0,
            grid=(N, n_c),
            in_specs=[
                pl.BlockSpec((1, c_tile, hw), lambda n, c: (n, c, 0)),
                pl.BlockSpec(memory_space=pltpu.MemorySpace.SMEM),
            ],
            out_specs=pl.BlockSpec((1, 1, hw), lambda n, c: (n, 0, 0)),
            scratch_shapes=[
                pltpu.VMEM((1, hw), jnp.float32),   # running channel sum
                pltpu.VMEM((1, hw), jnp.float32),   # running channel max
            ],
        ),
        compiler_params=pltpu.CompilerParams(
            dimension_semantics=("parallel", "arbitrary")),
    )(x_flat, w_flat)

    return out_flat.reshape(N, 1, H, W)


def spatial_attention_reference(x, w3, b3, w1, b1):
    """Pure-JAX reference with identical semantics (for a sanity check)."""
    avg = jnp.mean(x, axis=1, keepdims=True)
    mx = jnp.max(x, axis=1, keepdims=True)
    f = jnp.concatenate([avg, mx], axis=1)                  # (N, 2, H, W)
    w_eff = w3.at[:, :, 1, 1].add(w1[:, :, 0, 0])
    b_eff = (b3 + b1).reshape(1, 1, 1, 1)
    out = jax.lax.conv_general_dilated(
        f, w_eff, window_strides=(1, 1), padding="SAME",
        dimension_numbers=("NCHW", "OIHW", "NCHW"))
    return jax.nn.sigmoid(out + b_eff)


if __name__ == "__main__":
    key = jax.random.PRNGKey(0)
    kx, k3w, k3b, k1w, k1b = jax.random.split(key, 5)

    N, C, H, W = 2, 4, 16, 16
    x = jax.random.normal(kx, (N, C, H, W), dtype=jnp.float32)

    # Deterministic synthetic parameters (shapes dictated by the module init).
    w3 = 0.1 * jax.random.normal(k3w, (1, 2, 3, 3), dtype=jnp.float32)  # 3x3 branch
    b3 = 0.1 * jax.random.normal(k3b, (1,), dtype=jnp.float32)
    w1 = 0.1 * jax.random.normal(k1w, (1, 2, 1, 1), dtype=jnp.float32)  # 1x1 branch
    b1 = 0.1 * jax.random.normal(k1b, (1,), dtype=jnp.float32)

    out = spatial_attention(x, w3, b3, w1, b1)
    out = jax.block_until_ready(out)

    ref = jax.block_until_ready(spatial_attention_reference(x, w3, b3, w1, b1))
    assert out.shape == (N, 1, H, W)
    assert jnp.allclose(out, ref, atol=1e-5, rtol=1e-5), "mismatch vs JAX reference"

    print("KERNEL_OK")
</pallas_src>

<mosaic_0001>
module attributes {stable_mosaic.version = 11 : i64} {
  func.func @_spatial_attention_kernel(%arg0: i32, %arg1: i32, %arg2: memref<1x4x256xf32, #tpu.memory_space<vmem>>, %arg3: memref<19xf32, #tpu.memory_space<smem>>, %arg4: memref<1x1x256xf32, #tpu.memory_space<vmem>>, %arg5: memref<1x256xf32, #tpu.memory_space<vmem>>, %arg6: memref<1x256xf32, #tpu.memory_space<vmem>>) attributes {dimension_semantics = [#tpu.dimension_semantics<parallel>, #tpu.dimension_semantics<arbitrary>], iteration_bounds = array<i64: 2, 1>, scalar_prefetch = 0 : i64, scratch_operands = 2 : i64, tpu.core_type = #tpu.core_type<tc>, window_params = [{transform_indices = @transform_0, window_bounds = array<i64: 1, 4, 256>}, {transform_indices = @transform_1, window_bounds = array<i64: 19>}, {transform_indices = @transform_2, window_bounds = array<i64: 1, 1, 256>}]} {
    %c0 = arith.constant 0 : index
    %c0_0 = arith.constant 0 : index
    %c0_1 = arith.constant 0 : index
    %0 = vector.load %arg2[%c0, %c0_0, %c0_1] : memref<1x4x256xf32, #tpu.memory_space<vmem>>, vector<1x4x256xf32>
    %1 = vector.shape_cast %0 : vector<1x4x256xf32> to vector<4x256xf32>
    %c0_i32 = arith.constant 0 : i32
    %2 = arith.cmpi eq, %arg1, %c0_i32 : i32
    %3 = arith.extui %2 : i1 to i32
    %c0_i32_2 = arith.constant 0 : i32
    %4 = arith.cmpi ne, %3, %c0_i32_2 : i32
    scf.if %4 {
      %cst_14 = arith.constant 0.000000e+00 : f32
      %18 = vector.broadcast %cst_14 : f32 to vector<1x256xf32>
      %c0_15 = arith.constant 0 : index
      %c0_16 = arith.constant 0 : index
      %19 = vector.load %arg5[%c0_15, %c0_16] : memref<1x256xf32, #tpu.memory_space<vmem>>, vector<1x256xf32>
      tpu.vector_store %arg5[%c0_15, %c0_16], %18 {strides = array<i32>} : memref<1x256xf32, #tpu.memory_space<vmem>>, vector<1x256xf32>,
      %cst_17 = arith.constant 0xFF800000 : f32
      %20 = vector.broadcast %cst_17 : f32 to vector<1x256xf32>
      %c0_18 = arith.constant 0 : index
      %c0_19 = arith.constant 0 : index
      %21 = vector.load %arg6[%c0_18, %c0_19] : memref<1x256xf32, #tpu.memory_space<vmem>>, vector<1x256xf32>
      tpu.vector_store %arg6[%c0_18, %c0_19], %20 {strides = array<i32>} : memref<1x256xf32, #tpu.memory_space<vmem>>, vector<1x256xf32>,
    } else {
    }
    %c0_3 = arith.constant 0 : index
    %c0_4 = arith.constant 0 : index
    %5 = vector.load %arg5[%c0_3, %c0_4] : memref<1x256xf32, #tpu.memory_space<vmem>>, vector<1x256xf32>
    %cst = arith.constant dense<0.000000e+00> : vector<256xf32>
    %6 = vector.multi_reduction <add>, %1, %cst [0] : vector<4x256xf32> to vector<256xf32>
    %7 = vector.shape_cast %6 : vector<256xf32> to vector<1x256xf32>
    %8 = arith.addf %5, %7 : vector<1x256xf32>
    %c0_5 = arith.constant 0 : index
    %c0_6 = arith.constant 0 : index
    %9 = vector.load %arg5[%c0_5, %c0_6] : memref<1x256xf32, #tpu.memory_space<vmem>>, vector<1x256xf32>
    tpu.vector_store %arg5[%c0_5, %c0_6], %8 {strides = array<i32>} : memref<1x256xf32, #tpu.memory_space<vmem>>, vector<1x256xf32>,
    %c0_7 = arith.constant 0 : index
    %c0_8 = arith.constant 0 : index
    %10 = vector.load %arg6[%c0_7, %c0_8] : memref<1x256xf32, #tpu.memory_space<vmem>>, vector<1x256xf32>
    %cst_9 = arith.constant dense<0xFF800000> : vector<256xf32>
    %11 = vector.multi_reduction <maximumf>, %1, %cst_9 [0] : vector<4x256xf32> to vector<256xf32>
    %12 = vector.shape_cast %11 : vector<256xf32> to vector<1x256xf32>
    %13 = arith.maximumf %10, %12 : vector<1x256xf32>
    %c0_10 = arith.constant 0 : index
    %c0_11 = arith.constant 0 : index
    %14 = vector.load %arg6[%c0_10, %c0_11] : memref<1x256xf32, #tpu.memory_space<vmem>>, vector<1x256xf32>
    tpu.vector_store %arg6[%c0_10, %c0_11], %13 {strides = array<i32>} : memref<1x256xf32, #tpu.memory_space<vmem>>, vector<1x256xf32>,
    %c0_i32_12 = arith.constant 0 : i32
    %15 = arith.cmpi eq, %arg1, %c0_i32_12 : i32
    %16 = arith.extui %15 : i1 to i32
    %c0_i32_13 = arith.constant 0 : i32
    %17 = arith.cmpi ne, %16, %c0_i32_13 : i32
    scf.if %17 {
      %c0_14 = arith.constant 0 : index
      %c0_15 = arith.constant 0 : index
      %18 = vector.load %arg5[%c0_14, %c0_15] : memref<1x256xf32, #tpu.memory_space<vmem>>, vector<1x256xf32>
      %c0_16 = arith.constant 0 : index
      %c0_17 = arith.constant 0 : index
      %19 = vector.load %arg6[%c0_16, %c0_17] : memref<1x256xf32, #tpu.memory_space<vmem>>, vector<1x256xf32>
      %20 = tpu.iota {dimensions = array<i32: 1>} : vector<1x256xi32>
      %c16_i32 = arith.constant 16 : i32
      %c0_i32_18 = arith.constant 0 : i32
      %21 = arith.cmpi eq, %c16_i32, %c0_i32_18 : i32
      %c1_i32 = arith.constant 1 : i32
      %22 = arith.select %21, %c1_i32, %c16_i32 : i32
      %23 = vector.broadcast %22 : i32 to vector<1x256xi32>
      %24 = arith.remsi %20, %23 : vector<1x256xi32>
      %c0_i32_19 = arith.constant 0 : i32
      %25 = vector.broadcast %c0_i32_19 : i32 to vector<1x256xi32>
      %26 = arith.cmpi ne, %24, %25 : vector<1x256xi32>
      %c0_i32_20 = arith.constant 0 : i32
      %27 = vector.broadcast %c0_i32_20 : i32 to vector<1x256xi32>
      %28 = arith.cmpi slt, %24, %27 : vector<1x256xi32>
      %c0_i32_21 = arith.constant 0 : i32
      %29 = arith.cmpi slt, %22, %c0_i32_21 : i32
      %30 = vector.broadcast %29 : i1 to vector<1x256xi1>
      %31 = vector.broadcast %30 : vector<1x256xi1> to vector<1x256xi1>
      %32 = arith.xori %28, %31 : vector<1x256xi1>
      %33 = arith.andi %32, %26 : vector<1x256xi1>
      %34 = vector.broadcast %22 : i32 to vector<1x256xi32>
      %35 = arith.addi %24, %34 : vector<1x256xi32>
      %36 = arith.select %33, %35, %24 : vector<1x256xi1>, vector<1x256xi32>
      %cst_22 = arith.constant 0.000000e+00 : f32
      %37 = vector.broadcast %cst_22 : f32 to vector<1x17xf32>
      %38 = vector.extract_strided_slice %18 {offsets = [0, 0], sizes = [1, 239], strides = [1, 1]} : vector<1x256xf32> to vector<1x239xf32>
      %39 = tpu.concatenate %37, %38 in 1 : vector<1x17xf32>, vector<1x239xf32> -> vector<1x256xf32>
      %c1_i32_23 = arith.constant 1 : i32
      %40 = vector.broadcast %c1_i32_23 : i32 to vector<1x256xi32>
      %41 = arith.cmpi sge, %36, %40 : vector<1x256xi32>
      %cst_24 = arith.constant 0.000000e+00 : f32
      %42 = vector.broadcast %cst_24 : f32 to vector<1x256xf32>
      %43 = arith.select %41, %39, %42 : vector<1x256xi1>, vector<1x256xf32>
      %c0_25 = arith.constant 0 : index
      %44 = memref.load %arg3[%c0_25] : memref<19xf32, #tpu.memory_space<smem>>
      %45 = vector.broadcast %44 : f32 to vector<1x256xf32>
      %46 = arith.mulf %45, %43 : vector<1x256xf32>
      %cst_26 = arith.constant 0.000000e+00 : f32
      %47 = vector.broadcast %cst_26 : f32 to vector<1x16xf32>
      %48 = vector.extract_strided_slice %18 {offsets = [0, 0], sizes = [1, 240], strides = [1, 1]} : vector<1x256xf32> to vector<1x240xf32>
      %49 = tpu.concatenate %47, %48 in 1 : vector<1x16xf32>, vector<1x240xf32> -> vector<1x256xf32>
      %c1 = arith.constant 1 : index
      %50 = memref.load %arg3[%c1] : memref<19xf32, #tpu.memory_space<smem>>
      %51 = vector.broadcast %50 : f32 to vector<1x256xf32>
      %52 = arith.mulf %51, %49 : vector<1x256xf32>
      %53 = arith.addf %46, %52 : vector<1x256xf32>
      %cst_27 = arith.constant 0.000000e+00 : f32
      %54 = vector.broadcast %cst_27 : f32 to vector<1x15xf32>
      %55 = vector.extract_strided_slice %18 {offsets = [0, 0], sizes = [1, 241], strides = [1, 1]} : vector<1x256xf32> to vector<1x241xf32>
      %56 = tpu.concatenate %54, %55 in 1 : vector<1x15xf32>, vector<1x241xf32> -> vector<1x256xf32>
      %c14_i32 = arith.constant 14 : i32
      %57 = vector.broadcast %c14_i32 : i32 to vector<1x256xi32>
      %58 = arith.cmpi sle, %36, %57 : vector<1x256xi32>
      %cst_28 = arith.constant 0.000000e+00 : f32
      %59 = vector.broadcast %cst_28 : f32 to vector<1x256xf32>
      %60 = arith.select %58, %56, %59 : vector<1x256xi1>, vector<1x256xf32>
      %c2 = arith.constant 2 : index
      %61 = memref.load %arg3[%c2] : memref<19xf32, #tpu.memory_space<smem>>
      %62 = vector.broadcast %61 : f32 to vector<1x256xf32>
      %63 = arith.mulf %62, %60 : vector<1x256xf32>
      %64 = arith.addf %53, %63 : vector<1x256xf32>
      %cst_29 = arith.constant 0.000000e+00 : f32
      %65 = vector.broadcast %cst_29 : f32 to vector<1x1xf32>
      %66 = vector.extract_strided_slice %18 {offsets = [0, 0], sizes = [1, 255], strides = [1, 1]} : vector<1x256xf32> to vector<1x255xf32>
      %67 = tpu.concatenate %65, %66 in 1 : vector<1x1xf32>, vector<1x255xf32> -> vector<1x256xf32>
      %c1_i32_30 = arith.constant 1 : i32
      %68 = vector.broadcast %c1_i32_30 : i32 to vector<1x256xi32>
      %69 = arith.cmpi sge, %36, %68 : vector<1x256xi32>
      %cst_31 = arith.constant 0.000000e+00 : f32
      %70 = vector.broadcast %cst_31 : f32 to vector<1x256xf32>
      %71 = arith.select %69, %67, %70 : vector<1x256xi1>, vector<1x256xf32>
      %c3 = arith.constant 3 : index
      %72 = memref.load %arg3[%c3] : memref<19xf32, #tpu.memory_space<smem>>
      %73 = vector.broadcast %72 : f32 to vector<1x256xf32>
      %74 = arith.mulf %73, %71 : vector<1x256xf32>
      %75 = arith.addf %64, %74 : vector<1x256xf32>
      %c4 = arith.constant 4 : index
      %76 = memref.load %arg3[%c4] : memref<19xf32, #tpu.memory_space<smem>>
      %77 = vector.broadcast %76 : f32 to vector<1x256xf32>
      %78 = arith.mulf %77, %18 : vector<1x256xf32>
      %79 = arith.addf %75, %78 : vector<1x256xf32>
      %80 = vector.extract_strided_slice %18 {offsets = [0, 1], sizes = [1, 255], strides = [1, 1]} : vector<1x256xf32> to vector<1x255xf32>
      %cst_32 = arith.constant 0.000000e+00 : f32
      %81 = vector.broadcast %cst_32 : f32 to vector<1x1xf32>
      %82 = tpu.concatenate %80, %81 in 1 : vector<1x255xf32>, vector<1x1xf32> -> vector<1x256xf32>
      %c14_i32_33 = arith.constant 14 : i32
      %83 = vector.broadcast %c14_i32_33 : i32 to vector<1x256xi32>
      %84 = arith.cmpi sle, %36, %83 : vector<1x256xi32>
      %cst_34 = arith.constant 0.000000e+00 : f32
      %85 = vector.broadcast %cst_34 : f32 to vector<1x256xf32>
      %86 = arith.select %84, %82, %85 : vector<1x256xi1>, vector<1x256xf32>
      %c5 = arith.constant 5 : index
      %87 = memref.load %arg3[%c5] : memref<19xf32, #tpu.memory_space<smem>>
      %88 = vector.broadcast %87 : f32 to vector<1x256xf32>
      %89 = arith.mulf %88, %86 : vector<1x256xf32>
      %90 = arith.addf %79, %89 : vector<1x256xf32>
      %91 = vector.extract_strided_slice %18 {offsets = [0, 15], sizes = [1, 241], strides = [1, 1]} : vector<1x256xf32> to vector<1x241xf32>
      %cst_35 = arith.constant 0.000000e+00 : f32
      %92 = vector.broadcast %cst_35 : f32 to vector<1x15xf32>
      %93 = tpu.concatenate %91, %92 in 1 : vector<1x241xf32>, vector<1x15xf32> -> vector<1x256xf32>
      %c1_i32_36 = arith.constant 1 : i32
      %94 = vector.broadcast %c1_i32_36 : i32 to vector<1x256xi32>
      %95 = arith.cmpi sge, %36, %94 : vector<1x256xi32>
      %cst_37 = arith.constant 0.000000e+00 : f32
      %96 = vector.broadcast %cst_37 : f32 to vector<1x256xf32>
      %97 = arith.select %95, %93, %96 : vector<1x256xi1>, vector<1x256xf32>
      %c6 = arith.constant 6 : index
      %98 = memref.load %arg3[%c6] : memref<19xf32, #tpu.memory_space<smem>>
      %99 = vector.broadcast %98 : f32 to vector<1x256xf32>
      %100 = arith.mulf %99, %97 : vector<1x256xf32>
      %101 = arith.addf %90, %100 : vector<1x256xf32>
      %102 = vector.extract_strided_slice %18 {offsets = [0, 16], sizes = [1, 240], strides = [1, 1]} : vector<1x256xf32> to vector<1x240xf32>
      %cst_38 = arith.constant 0.000000e+00 : f32
      %103 = vector.broadcast %cst_38 : f32 to vector<1x16xf32>
      %104 = tpu.concatenate %102, %103 in 1 : vector<1x240xf32>, vector<1x16xf32> -> vector<1x256xf32>
      %c7 = arith.constant 7 : index
      %105 = memref.load %arg3[%c7] : memref<19xf32, #tpu.memory_space<smem>>
      %106 = vector.broadcast %105 : f32 to vector<1x256xf32>
      %107 = arith.mulf %106, %104 : vector<1x256xf32>
      %108 = arith.addf %101, %107 : vector<1x256xf32>
      %109 = vector.extract_strided_slice %18 {offsets = [0, 17], sizes = [1, 239], strides = [1, 1]} : vector<1x256xf32> to vector<1x239xf32>
      %cst_39 = arith.constant 0.000000e+00 : f32
      %110 = vector.broadcast %cst_39 : f32 to vector<1x17xf32>
      %111 = tpu.concatenate %109, %110 in 1 : vector<1x239xf32>, vector<1x17xf32> -> vector<1x256xf32>
      %c14_i32_40 = arith.constant 14 : i32
      %112 = vector.broadcast %c14_i32_40 : i32 to vector<1x256xi32>
      %113 = arith.cmpi sle, %36, %112 : vector<1x256xi32>
      %cst_41 = arith.constant 0.000000e+00 : f32
      %114 = vector.broadcast %cst_41 : f32 to vector<1x256xf32>
      %115 = arith.select %113, %111, %114 : vector<1x256xi1>, vector<1x256xf32>
      %c8 = arith.constant 8 : index
      %116 = memref.load %arg3[%c8] : memref<19xf32, #tpu.memory_space<smem>>
      %117 = vector.broadcast %116 : f32 to vector<1x256xf32>
      %118 = arith.mulf %117, %115 : vector<1x256xf32>
      %119 = arith.addf %108, %118 : vector<1x256xf32>
      %cst_42 = arith.constant 0.000000e+00 : f32
      %120 = vector.broadcast %cst_42 : f32 to vector<1x17xf32>
      %121 = vector.extract_strided_slice %19 {offsets = [0, 0], sizes = [1, 239], strides = [1, 1]} : vector<1x256xf32> to vector<1x239xf32>
      %122 = tpu.concatenate %120, %121 in 1 : vector<1x17xf32>, vector<1x239xf32> -> vector<1x256xf32>
      %c1_i32_43 = arith.constant 1 : i32
      %123 = vector.broadcast %c1_i32_43 : i32 to vector<1x256xi32>
      %124 = arith.cmpi sge, %36, %123 : vector<1x256xi32>
      %cst_44 = arith.constant 0.000000e+00 : f32
      %125 = vector.broadcast %cst_44 : f32 to vector<1x256xf32>
      %126 = arith.select %124, %122, %125 : vector<1x256xi1>, vector<1x256xf32>
      %c9 = arith.constant 9 : index
      %127 = memref.load %arg3[%c9] : memref<19xf32, #tpu.memory_space<smem>>
      %128 = vector.broadcast %127 : f32 to vector<1x256xf32>
      %129 = arith.mulf %128, %126 : vector<1x256xf32>
      %130 = arith.addf %119, %129 : vector<1x256xf32>
      %cst_45 = arith.constant 0.000000e+00 : f32
      %131 = vector.broadcast %cst_45 : f32 to vector<1x16xf32>
      %132 = vector.extract_strided_slice %19 {offsets = [0, 0], sizes = [1, 240], strides = [1, 1]} : vector<1x256xf32> to vector<1x240xf32>
      %133 = tpu.concatenate %131, %132 in 1 : vector<1x16xf32>, vector<1x240xf32> -> vector<1x256xf32>
      %c10 = arith.constant 10 : index
      %134 = memref.load %arg3[%c10] : memref<19xf32, #tpu.memory_space<smem>>
      %135 = vector.broadcast %134 : f32 to vector<1x256xf32>
      %136 = arith.mulf %135, %133 : vector<1x256xf32>
      %137 = arith.addf %130, %136 : vector<1x256xf32>
      %cst_46 = arith.constant 0.000000e+00 : f32
      %138 = vector.broadcast %cst_46 : f32 to vector<1x15xf32>
      %139 = vector.extract_strided_slice %19 {offsets = [0, 0], sizes = [1, 241], strides = [1, 1]} : vector<1x256xf32> to vector<1x241xf32>
      %140 = tpu.concatenate %138, %139 in 1 : vector<1x15xf32>, vector<1x241xf32> -> vector<1x256xf32>
      %c14_i32_47 = arith.constant 14 : i32
      %141 = vector.broadcast %c14_i32_47 : i32 to vector<1x256xi32>
      %142 = arith.cmpi sle, %36, %141 : vector<1x256xi32>
      %cst_48 = arith.constant 0.000000e+00 : f32
      %143 = vector.broadcast %cst_48 : f32 to vector<1x256xf32>
      %144 = arith.select %142, %140, %143 : vector<1x256xi1>, vector<1x256xf32>
      %c11 = arith.constant 11 : index
      %145 = memref.load %arg3[%c11] : memref<19xf32, #tpu.memory_space<smem>>
      %146 = vector.broadcast %145 : f32 to vector<1x256xf32>
      %147 = arith.mulf %146, %144 : vector<1x256xf32>
      %148 = arith.addf %137, %147 : vector<1x256xf32>
      %cst_49 = arith.constant 0.000000e+00 : f32
      %149 = vector.broadcast %cst_49 : f32 to vector<1x1xf32>
      %150 = vector.extract_strided_slice %19 {offsets = [0, 0], sizes = [1, 255], strides = [1, 1]} : vector<1x256xf32> to vector<1x255xf32>
      %151 = tpu.concatenate %149, %150 in 1 : vector<1x1xf32>, vector<1x255xf32> -> vector<1x256xf32>
      %c1_i32_50 = arith.constant 1 : i32
      %152 = vector.broadcast %c1_i32_50 : i32 to vector<1x256xi32>
      %153 = arith.cmpi sge, %36, %152 : vector<1x256xi32>
      %cst_51 = arith.constant 0.000000e+00 : f32
      %154 = vector.broadcast %cst_51 : f32 to vector<1x256xf32>
      %155 = arith.select %153, %151, %154 : vector<1x256xi1>, vector<1x256xf32>
      %c12 = arith.constant 12 : index
      %156 = memref.load %arg3[%c12] : memref<19xf32, #tpu.memory_space<smem>>
      %157 = vector.broadcast %156 : f32 to vector<1x256xf32>
      %158 = arith.mulf %157, %155 : vector<1x256xf32>
      %159 = arith.addf %148, %158 : vector<1x256xf32>
      %c13 = arith.constant 13 : index
      %160 = memref.load %arg3[%c13] : memref<19xf32, #tpu.memory_space<smem>>
      %161 = vector.broadcast %160 : f32 to vector<1x256xf32>
      %162 = arith.mulf %161, %19 : vector<1x256xf32>
      %163 = arith.addf %159, %162 : vector<1x256xf32>
      %164 = vector.extract_strided_slice %19 {offsets = [0, 1], sizes = [1, 255], strides = [1, 1]} : vector<1x256xf32> to vector<1x255xf32>
      %cst_52 = arith.constant 0.000000e+00 : f32
      %165 = vector.broadcast %cst_52 : f32 to vector<1x1xf32>
      %166 = tpu.concatenate %164, %165 in 1 : vector<1x255xf32>, vector<1x1xf32> -> vector<1x256xf32>
      %c14_i32_53 = arith.constant 14 : i32
      %167 = vector.broadcast %c14_i32_53 : i32 to vector<1x256xi32>
      %168 = arith.cmpi sle, %36, %167 : vector<1x256xi32>
      %cst_54 = arith.constant 0.000000e+00 : f32
      %169 = vector.broadcast %cst_54 : f32 to vector<1x256xf32>
      %170 = arith.select %168, %166, %169 : vector<1x256xi1>, vector<1x256xf32>
      %c14 = arith.constant 14 : index
      %171 = memref.load %arg3[%c14] : memref<19xf32, #tpu.memory_space<smem>>
      %172 = vector.broadcast %171 : f32 to vector<1x256xf32>
      %173 = arith.mulf %172, %170 : vector<1x256xf32>
      %174 = arith.addf %163, %173 : vector<1x256xf32>
      %175 = vector.extract_strided_slice %19 {offsets = [0, 15], sizes = [1, 241], strides = [1, 1]} : vector<1x256xf32> to vector<1x241xf32>
      %cst_55 = arith.constant 0.000000e+00 : f32
      %176 = vector.broadcast %cst_55 : f32 to vector<1x15xf32>
      %177 = tpu.concatenate %175, %176 in 1 : vector<1x241xf32>, vector<1x15xf32> -> vector<1x256xf32>
      %c1_i32_56 = arith.constant 1 : i32
      %178 = vector.broadcast %c1_i32_56 : i32 to vector<1x256xi32>
      %179 = arith.cmpi sge, %36, %178 : vector<1x256xi32>
      %cst_57 = arith.constant 0.000000e+00 : f32
      %180 = vector.broadcast %cst_57 : f32 to vector<1x256xf32>
      %181 = arith.select %179, %177, %180 : vector<1x256xi1>, vector<1x256xf32>
      %c15 = arith.constant 15 : index
      %182 = memref.load %arg3[%c15] : memref<19xf32, #tpu.memory_space<smem>>
      %183 = vector.broadcast %182 : f32 to vector<1x256xf32>
      %184 = arith.mulf %183, %181 : vector<1x256xf32>
      %185 = arith.addf %174, %184 : vector<1x256xf32>
      %186 = vector.extract_strided_slice %19 {offsets = [0, 16], sizes = [1, 240], strides = [1, 1]} : vector<1x256xf32> to vector<1x240xf32>
      %cst_58 = arith.constant 0.000000e+00 : f32
      %187 = vector.broadcast %cst_58 : f32 to vector<1x16xf32>
      %188 = tpu.concatenate %186, %187 in 1 : vector<1x240xf32>, vector<1x16xf32> -> vector<1x256xf32>
      %c16 = arith.constant 16 : index
      %189 = memref.load %arg3[%c16] : memref<19xf32, #tpu.memory_space<smem>>
      %190 = vector.broadcast %189 : f32 to vector<1x256xf32>
      %191 = arith.mulf %190, %188 : vector<1x256xf32>
      %192 = arith.addf %185, %191 : vector<1x256xf32>
      %193 = vector.extract_strided_slice %19 {offsets = [0, 17], sizes = [1, 239], strides = [1, 1]} : vector<1x256xf32> to vector<1x239xf32>
      %cst_59 = arith.constant 0.000000e+00 : f32
      %194 = vector.broadcast %cst_59 : f32 to vector<1x17xf32>
      %195 = tpu.concatenate %193, %194 in 1 : vector<1x239xf32>, vector<1x17xf32> -> vector<1x256xf32>
      %c14_i32_60 = arith.constant 14 : i32
      %196 = vector.broadcast %c14_i32_60 : i32 to vector<1x256xi32>
      %197 = arith.cmpi sle, %36, %196 : vector<1x256xi32>
      %cst_61 = arith.constant 0.000000e+00 : f32
      %198 = vector.broadcast %cst_61 : f32 to vector<1x256xf32>
      %199 = arith.select %197, %195, %198 : vector<1x256xi1>, vector<1x256xf32>
      %c17 = arith.constant 17 : index
      %200 = memref.load %arg3[%c17] : memref<19xf32, #tpu.memory_space<smem>>
      %201 = vector.broadcast %200 : f32 to vector<1x256xf32>
      %202 = arith.mulf %201, %199 : vector<1x256xf32>
      %203 = arith.addf %192, %202 : vector<1x256xf32>
      %c18 = arith.constant 18 : index
      %204 = memref.load %arg3[%c18] : memref<19xf32, #tpu.memory_space<smem>>
      %205 = vector.broadcast %204 : f32 to vector<1x256xf32>
      %206 = arith.addf %203, %205 : vector<1x256xf32>
      %207 = arith.negf %206 : vector<1x256xf32>
      %208 = math.exp %207 : vector<1x256xf32>
      %cst_62 = arith.constant 1.000000e+00 : f32
      %209 = vector.broadcast %cst_62 : f32 to vector<1x256xf32>
      %210 = arith.addf %209, %208 : vector<1x256xf32>
      %211 = arith.divf %209, %210 : vector<1x256xf32>
      %c0_63 = arith.constant 0 : index
      %c0_64 = arith.constant 0 : index
      %c0_65 = arith.constant 0 : index
      %212 = vector.load %arg4[%c0_63, %c0_64, %c0_65] : memref<1x1x256xf32, #tpu.memory_space<vmem>>, vector<1x1x256xf32>
      %213 = vector.shape_cast %212 : vector<1x1x256xf32> to vector<1x256xf32>
      %214 = vector.shape_cast %211 : vector<1x256xf32> to vector<1x1x256xf32>
      tpu.vector_store %arg4[%c0_63, %c0_64, %c0_65], %214 {strides = array<i32>} : memref<1x1x256xf32, #tpu.memory_space<vmem>>, vector<1x1x256xf32>,
    } else {
    }
    return
  }
  func.func @transform_0(%arg0: i32, %arg1: i32) -> (i32, i32, i32) {
    %c0_i32 = arith.constant 0 : i32
    %c0_i32_0 = arith.constant 0 : i32
    return %arg0, %arg1, %c0_i32 : i32, i32, i32
  }
  func.func @transform_1(%arg0: i32, %arg1: i32) -> i32 {
    %c0_i32 = arith.constant 0 : i32
    %c0_i32_0 = arith.constant 0 : i32
    return %c0_i32 : i32
  }
  func.func @transform_2(%arg0: i32, %arg1: i32) -> (i32, i32, i32) {
    %c0_i32 = arith.constant 0 : i32
    %c0_i32_0 = arith.constant 0 : i32
    %c0_i32_1 = arith.constant 0 : i32
    return %arg0, %c0_i32, %c0_i32_0 : i32, i32, i32
  }
}

</mosaic_0001>

<bundles_post_ra>
// kernel: tpu_custom_call.1
= control target key start
LH: loop header
LB: loop body
LE: loop exit
PB: predicated region body
PF: predicated region fallthrough
CT: control target
= control target key end

     0   :  { %7 = vsyncpa [#allocation5], 0  ;;  %s1404_s0 = inlined_call_operand.hbm [shape: f32[2,4,256], index: 0, kind: input, shape index: {}]   ;;  %s1405_s1 = inlined_call_operand.hbm [shape: f32[19], index: 1, kind: input, shape index: {}]   ;;  %s1406_s2 = inlined_call_operand.hbm [shape: f32[2,1,256], index: 2, kind: output, shape index: {}]  }
   0x1   :  { %9 = vsyncpa [#allocation5 + $0x1], 0 }
   0x2   :  { %10 = vsyncpa [#allocation7], 0 }
   0x3   :  { %11 = vsyncpa [#allocation6], 0 }
   0x4   :  { %13 = vsyncpa [#allocation6 + $0x1], 0  ;;  %s1024_s9 = smov 0   ;;  %s1026_s10 = smov 0  }
   0x5   :  { %s1028_s11 = smov 0   ;;  %s1030_s12 = smov 0  }
   0x6   :  { %s1032_s13 = smov 0   ;;  %s1034_s14 = smov 0  }
   0x7 LB: > { %s737_s15 = sadd.s32 4294967295, %s996_s14   ;;  %s738_s16 = sadd.s32 4294967294, %s996_s14   ;;  %s996_s14 = sphi %s1034_s14, %s19_s14   ;;  %s992_s13 = sphi %s1032_s13, %s1428_s13   ;;  %s988_s12 = sphi %s1030_s12, %s1427_s12   ;;  %s984_s11 = sphi %s1028_s11, %s1426_s11   ;;  %s980_s10 = sphi %s1026_s10, %s1425_s10   ;;  %s976_s9 = sphi %s1024_s9, %s1424_s9  }
   0x8   : > { %p53_p0 = scmp.ne.s32.totalorder %s980_s10, %s976_s9  ;;  %p1058_p1 = scmp.eq.s32.totalorder %s737_s15, 0 }
   0x9   : > { %p1062_p2 = scmp.eq.s32.totalorder %s737_s15, 1  ;;  %p104_p3 = scmp.eq.s32.totalorder %s738_s16, 1 }
   0xa   : > { %p1068_p4 = por %p1058_p1, %p53_p0  ;;  %p739_p5 = scmp.ge.s32.totalorder %s996_s14, 1 }
   0xb   : > { %p1073_p6 = por %p104_p3, %p53_p0  ;;  %p111_p7 = scmp.lt.s32.totalorder %s996_s14, 3 }
   0xc   : > { %s123_s23 = sshll.u32 %s1405_s1, 4  ;;  %s31_s25 = sadd.s32 1, %s992_s13  ;;  %s124_s23 = int_to_ptr.hbm [resolvable:$true] %s123_s23 }
   0xd   : > { %p1081_p8 = pnand %p739_p5, %p111_p7  ;;  %s40_s26 = sadd.s32 1, %s984_s11 }
   0xe   : > { %p33_p12 = scmp.ge.s32.totalorder %s31_s25, 2  ;;  %s998_s27 = smov [#allocation8]  }
   0xf   : > { %p782_p10 = pneg %p1081_p8  ;;  %p47_p13 = scmp.ne.s32.totalorder %s984_s11, %s980_s10 }
  0x10   : > { %s1430_s25 = smov (%p33_p12, %s31_s25), 0  ;;  %p48_p0 = scmp.eq.s32.totalorder %s996_s14, 0 }
  0x11   : > { %p783_p11 = pnand %p782_p10, %p1058_p1  ;;  %s35_s28 = ssub.s32 %s992_s13, %s1430_s25 }
  0x12   : > { %p795_p3 = scmp.lt.s32.totalorder %s996_s14, 2  ;;  %p38_p5 = scmp.eq.s32.totalorder %s35_s28, 0 }
  0x13   : > { %785 = dma.hbm_to_smem (!%p783_p11), %s124_s23, 16, %s998_s27, [#allocation7]  }
  0x14   : > { %p49_p7 = por %p48_p0, %p47_p13  ;;  %p1102_p9 = por %p1062_p2, %p47_p13 }
  0x15   : > { %s134_s30 = sand.u32 1, %s984_s11   ;;  %s773_s5 = sshll.u32 %s992_s13, 3 }
  0x16   : > { %s1108_s3 = scalar_select %p38_p5, %s984_s11, %s40_s26  }
  0x17   : > { %s742_s4 = sshll.u32 %s134_s30, 3  ;;  %s145_s8 = scalar_lea.hbm %s1404_s0, %s773_s5 }
  0x18   : > { %s138_s15 = scalar_lea.vmem [#allocation4], %s742_s4  ;;  %s147_s21 = sshll.u32 %s145_s8, 4  ;;  %s148_s21 = int_to_ptr.hbm [resolvable:$true] %s147_s21 }
  0x19   : > { %s149_s16 = sshll.u32 %s138_s15, 4  ;;  %p787_p10 = pnand %p795_p3, %p49_p7  ;;  %s150_s16 = int_to_ptr.vmem [resolvable:$true] %s149_s16 }
  0x1a   : > { %s135_s18 = scalar_lea.sflag [#allocation5], %s134_s30  ;;  %158 = sbr.rel (%p1081_p8) target bundleno = 309 (0x135), region = 28 }
  0x1b   : > { %789 = dma.hbm_to_vmem [thread:$0]  (!%p787_p10), %s148_s21, 128, %s150_s16, %s135_s18  }
  0x1c   : > { %s1119_s22 = sand.u32 (!%p1081_p8), 1, %s980_s10  }
  0x1d   : > { %s746_s23 = sshll.u32 (!%p1081_p8), %s1119_s22, 3  ;;  %s161_s26 = scalar_lea.sflag (!%p1081_p8), [#allocation5], %s1119_s22 }
  0x1e   : > { %s164_s27 = scalar_lea.vmem (!%p1081_p8), [#allocation4], %s746_s23 }
  0x1f   : > { %963 = dma.done.wait (%p1068_p4), %s161_s26, 128  }
  0x20   : > { %965 = vsyncadd (%p1068_p4), %s161_s26, 4294967168 }
  0x21   : > { %967 = dma.done.wait (%p1058_p1), [#allocation7], 16  }
  0x22   : > { %969 = vsyncadd (%p1058_p1), [#allocation7], 4294967280 }
  0x23   : > { %175 = sfence }
  0x24   : > { %v192_v0 = vld [vmem:[%s164_s27] sm:$0xff]  ;;  %v197_v1 = vlaneseq  ;;  %v999_v3 = vmov 0.0   ;;  %vm210_vm1 = vcmask 1043456   ;;  %vm228_vm2 = vcmask 1040384   ;;  %s1001_s17 = smov 16   ;;  %s1002_s19 = smov 17  }
  0x25   : > { %205 = vst [vmem:[#allocation1] ss:$2 sm:$0xff] %v192_v0  ;;  %v1000_v35 = vmov -inf   ;;  %s1003_s24 = smov 15   ;;  %s1004_s28 = smov 1   ;;  %vm303_vm3 = vcmask 138240  }
  0x26   : > { %vm1132_vm0 = vcmp.lt.s32.totalorder %v197_v1, 256  ;;  %s1005_s30 = smov 127   ;;  %s1006_s4 = smov 113   ;;  %v270_v59 = vand.u32 127, %v197_v1  ;;  %vm320_vm5 = vcmask 130048   ;;  %vm354_vm6 = vcmask 7168  }
  0x27   : > { %201 = vst.msk [vmem:[#allocation2] sm:$0x3] %vm1132_vm0, %v999_v3  ;;  %s1007_s5 = smov 111   ;;  %s1008_s6 = smov 112   ;;  %vm335_vm7 = vcmask 121856   ;;  %vm381_vm11 = vcmask 1039360  }
  0x28   : > { %202 = vst.msk [vmem:[#allocation3] sm:$0x3] %vm1132_vm0, %v1000_v35  ;;  %v271_v60 = vadd.s32 128, %v270_v59  ;;  %s1173_s7 = sld [smem:[#allocation8 + $0x1]]  ;;  %vm398_vm12 = vcmask 924672   ;;  %vm415_vm13 = vcmask 916480  }
  0x29   : > { %s1175_s8 = sld [smem:[#allocation8]]  ;;  %vm430_vm14 = vcmask 908288  }
  0x2a   : > { %s1182_s15 = sld [smem:[#allocation8 + $0x4]] }
  0x2b   : > { %s1184_s16 = sld [smem:[#allocation8 + $0x3]] }
  0x2c   : > { %v206_v4 = vld.sshfl [vmem:[#allocation1] sm:$0xff pattern:$0x75316420]  ;;  %v207_v5 = vld.sshfl [vmem:[#allocation1 + $0x8] sm:$0xff pattern:$0x75316420] }
  0x2d   : > { %v211_v6 = vsel %vm210_vm1, %v206_v4, 0.0  ;;  %v218_v7 = vsel %vm210_vm1, %v207_v5, 0.0  ;;  %238 = vst [vmem:[#allocation1] ss:$2 sm:$0xff] %v192_v0  ;;  %v283_v0 = vand.u32 15, %v271_v60  ;;  %s1190_s21 = sld [smem:[#allocation8 + $0x2]] }
  0x2e   : > { %v212_v8 = vrot.slane %v211_v6, 4  ;;  %v219_v9 = vrot.slane %v218_v7, 4  ;;  %v203_v27 = vld [vmem:[#allocation2] sm:$0x3]  ;;  %s1213_s18 = sld [smem:[#allocation8 + $0x5]] }
  0x2f   : > { %v237_v42 = vld [vmem:[#allocation3] sm:$0x3]  ;;  %vm1177_vm4 = vcmp.ge.s32.totalorder %v283_v0, 1  ;;  %vm1199_vm8 = vcmp.le.s32.totalorder %v283_v0, 14  ;;  %s1231_s23 = sld [smem:[#allocation8 + $0x6]] }
  0x30   : > { %v213_v10 = vadd.f32 %v212_v8, %v211_v6  ;;  %v220_v11 = vadd.f32 %v219_v9, %v218_v7  ;;  %v276_v9 = vand.u32 15, %v270_v59  ;;  %s1238_s26 = sld [smem:[#allocation8 + $0x7]] }
  0x31   : > { %s1251_s27 = sld [smem:[#allocation8 + $0x8]] }
  0x32   : > { %v214_v12 = vrot.slane %v213_v10, 2  ;;  %v221_v13 = vrot.slane %v220_v11, 2  ;;  %vm1205_vm9 = vcmp.ge.s32.totalorder %v276_v9, 1  ;;  %vm1223_vm10 = vcmp.le.s32.totalorder %v276_v9, 14 }
  0x34   : > { %v215_v14 = vadd.f32 %v214_v12, %v213_v10  ;;  %v222_v15 = vadd.f32 %v221_v13, %v220_v11  ;;  %v240_v16 = vld.sshfl [vmem:[#allocation1 + $0x8] sm:$0xff pattern:$0x75316420]  ;;  %v239_v20 = vld.sshfl [vmem:[#allocation1] sm:$0xff pattern:$0x75316420]  ;;  %v326_v10 = vstv %s1173_s7  ;;  %v313_v11 = vstv %s1175_s8 }
  0x35   : > { %v250_v17 = vsel %vm210_vm1, %v240_v16, -inf  ;;  %v243_v22 = vsel %vm210_vm1, %v239_v20, -inf  ;;  %s1327_s7 = sld [smem:[#allocation8 + $0x11]] }
  0x36   : > { %v216_v18 = vrot.slane %v215_v14, 1  ;;  %v223_v19 = vrot.slane %v222_v15, 1  ;;  %v251_v21 = vrot.slane %v250_v17, 4  ;;  %v244_v25 = vrot.slane %v243_v22, 4  ;;  %s1343_s8 = sld [smem:[#allocation8 + $0x12]] }
  0x37   : > { %v421_v60 = vstv %s1238_s26 }
  0x38   : > { %v217_v23 = vadd.f32 %v216_v18, %v215_v14  ;;  %v224_v24 = vadd.f32 %v223_v19, %v222_v15  ;;  %v252_v26 = vmax.f32 %v250_v17, %v251_v21  ;;  %v245_v29 = vmax.f32 %v243_v22, %v244_v25 }
  0x39   : > { %v368_v18 = vstv %s1182_s15  ;;  %v362_v21 = vstv %s1184_s16  ;;  %v345_v25 = vstv %s1190_s21  ;;  %s748_s15 = sshll.u32 %s1119_s22, 1  ;;  %s770_s16 = sshll.u32 %s988_s12, 1 }
  0x3a   : > { %v227_v28 = vrot.slane %v224_v24, 7  ;;  %v253_v30 = vrot.slane %v252_v26, 2  ;;  %v246_v32 = vrot.slane %v245_v29, 2  ;;  %s191_s26 = scalar_lea.vmem [#allocation9], %s748_s15 }
  0x3c   : > { %v229_v31 = vsel %vm228_vm2, %v217_v23, %v227_v28  ;;  %v254_v33 = vmax.f32 %v252_v26, %v253_v30  ;;  %v247_v36 = vmax.f32 %v245_v29, %v246_v32 }
  0x3d   : > { %v231_v34 = vadd.f32 %v229_v31, %v203_v27 }
  0x3e   : > { %v255_v37 = vrot.slane %v254_v33, 1  ;;  %v248_v38 = vrot.slane %v247_v36, 1 }
  0x3f   : > { %236 = vst.msk [vmem:[#allocation2] sm:$0x3] %vm1132_vm0, %v231_v34 }
  0x40   : > { %v256_v39 = vmax.f32 %v254_v33, %v255_v37  ;;  %v249_v40 = vmax.f32 %v247_v36, %v248_v38 }
  0x42   : > { %v259_v41 = vrot.slane %v256_v39, 7 }
  0x44   : > { %v260_v43 = vsel %vm228_vm2, %v249_v40, %v259_v41 }
  0x45   : > { %v262_v44 = vmax.f32 %v237_v42, %v260_v43 }
  0x46   : > { %v1148_v45 = vld [vmem:[#allocation2] sm:$0x3] }
  0x47   : > { %v297_v46 = vperm.slane %v1148_v45, 0  ;;  %263 = vst.msk [vmem:[#allocation3] sm:$0x3] %vm1132_vm0, %v262_v44  ;;  %v298_v47 = vperm.slane %v1148_v45, 1  ;;  %v1229_v29 = vmul.f32 %v368_v18, %v1148_v45  ;;  %v389_v44 = vstv %s1213_s18 }
  0x49   : > { %316 = vrot.lane.b32.xlu1 %v297_v46, %s1001_s17  ;;  %299 = vrot.lane.b32.xlu0 %v297_v46, %s1002_s19  ;;  %v372_v41 = vperm.slane %v1229_v29, 1 }
  0x4a   : > { %331 = vrot.lane.b32.xlu2 %v297_v46, %s1003_s24 }
  0x4e   : > { %v1158_v48 = vld [vmem:[#allocation3] sm:$0x3] }
  0x4f   : > { %v444_v49 = vperm.slane %v1158_v48, 0  ;;  %v445_v50 = vperm.slane %v1158_v48, 1 }
  0x51   : > { %318 = vrot.lane.b32.xlu1 %v298_v47, %s1001_s17  ;;  %301 = vrot.lane.b32.xlu0 %v298_v47, %s1002_s19 }
  0x52   : > { %333 = vrot.lane.b32.xlu2 %v298_v47, %s1003_s24 }
  0x59   : > { %352 = vrot.lane.b32.xlu1 %v298_v47, %s1004_s28  ;;  %350 = vrot.lane.b32.xlu0 %v297_v46, %s1004_s28 }
  0x5a   : > { %379 = vrot.lane.b32.xlu2 %v298_v47, %s1005_s30 }
  0x61   : > { %396 = vrot.lane.b32.xlu1 %v298_v47, %s1006_s4  ;;  %377 = vrot.lane.b32.xlu0 %v297_v46, %s1005_s30 }
  0x62   : > { %394 = vrot.lane.b32.xlu2 %v297_v46, %s1006_s4 }
  0x69   : > { %428 = vrot.lane.b32.xlu1 %v298_v47, %s1007_s5  ;;  %413 = vrot.lane.b32.xlu0 %v298_v47, %s1008_s6 }
  0x6a   : > { %411 = vrot.lane.b32.xlu2 %v297_v46, %s1008_s6 }
  0x71   : > { %446 = vrot.lane.b32.xlu1 %v444_v49, %s1002_s19  ;;  %426 = vrot.lane.b32.xlu0 %v297_v46, %s1007_s5 }
  0x72   : > { %448 = vrot.lane.b32.xlu2 %v445_v50, %s1002_s19  ;;  %s1266_s19 = sld [smem:[#allocation8 + $0xa]] }
  0x79   : > { %464 = vrot.lane.b32.xlu1 %v445_v50, %s1001_s17  ;;  %462 = vrot.lane.b32.xlu0 %v444_v49, %s1001_s17  ;;  %s1258_s17 = sld [smem:[#allocation8 + $0x9]] }
  0x7a   : > { %476 = vrot.lane.b32.xlu2 %v444_v49, %s1003_s24 }
  0x81   : > { %492 = vrot.lane.b32.xlu1 %v444_v49, %s1004_s28  ;;  %478 = vrot.lane.b32.xlu0 %v445_v50, %s1003_s24  ;;  %s1275_s24 = sld [smem:[#allocation8 + $0xb]] }
  0x82   : > { %494 = vrot.lane.b32.xlu2 %v445_v50, %s1004_s28  ;;  %s1283_s28 = sld [smem:[#allocation8 + $0xc]] }
  0x89   : > { %518 = vrot.lane.b32.xlu1 %v444_v49, %s1005_s30  ;;  %520 = vrot.lane.b32.xlu0 %v445_v50, %s1005_s30  ;;  %s1285_s30 = sld [smem:[#allocation8 + $0xd]] }
  0x8a   : > { %536 = vrot.lane.b32.xlu2 %v445_v50, %s1006_s4 }
  0x91   : > { %552 = vrot.lane.b32.xlu1 %v445_v50, %s1008_s6  ;;  %534 = vrot.lane.b32.xlu0 %v444_v49, %s1006_s4  ;;  %s1301_s4 = sld [smem:[#allocation8 + $0xe]] }
  0x92   : > { %566 = vrot.lane.b32.xlu2 %v445_v50, %s1007_s5 }
  0x99   : > { %564 = vrot.lane.b32.xlu1 %v444_v49, %s1007_s5  ;;  %550 = vrot.lane.b32.xlu0 %v444_v49, %s1008_s6  ;;  %s1318_s5 = sld [smem:[#allocation8 + $0xf]] }
  0x9a   : > { %s1324_s6 = sld [smem:[#allocation8 + $0x10]] }
  0xa4   : > { %v332_v51 = vpop.permute.xlu2 %331 }
  0xa5   : > { %v339_v28 = vsel %vm335_vm7, 0.0, %v332_v51 }
  0xa6   : > { %v342_v37 = vsel %vm1223_vm10, %v339_v28, 0.0  ;;  %v471_v28 = vstv %s1266_s19 }
  0xa7   : > { %v346_v49 = vmul.f32 %v345_v25, %v342_v37 }
  0xac   : > { %v334_v52 = vpop.permute.xlu2 %333 }
  0xad   : > { %v336_v13 = vsel %vm335_vm7, %v332_v51, %v334_v52  ;;  %v406_v52 = vstv %s1231_s23  ;;  %s639_s23 = scalar_lea.hbm %s1406_s2, %s770_s16 }
  0xae   : > { %v343_v20 = vsel %vm1199_vm8, %v336_v13, 0.0  ;;  %s643_s12 = sshll.u32 %s639_s23, 4  ;;  %s644_s12 = int_to_ptr.hbm [resolvable:$true] %s643_s12 }
  0xaf   : > { %v347_v32 = vmul.f32 %v345_v25, %v343_v20  ;;  %v457_v20 = vstv %s1258_s17  ;;  %s629_s17 = scalar_lea.sflag [#allocation6], %s1119_s22  ;;  %s924_s19 = sshra.s32 %s644_s12, 4  ;;  %s925_s19 = int_to_ptr.hbm [resolvable:$true] %s924_s19 }
  0xb0   : > { %p931_p8 = scmp.lt.s32.totalorder %s925_s19, %s1406_s2 }
  0xb4   : > { %v1166_v53 = vpop.permute.xlu2 %379 }
  0xb5   : > { %v385_v35 = vsel %vm381_vm11, %v1166_v53, 0.0 }
  0xb6   : > { %v387_v45 = vsel %vm1199_vm8, %v385_v35, 0.0 }
  0xbb   : > { %v317_v54 = vpop.permute.xlu1 %316  ;;  %v300_v55 = vpop.permute.xlu0 %299 }
  0xbc   : > { %v1168_v56 = vpop.permute.xlu2 %394  ;;  %v307_v19 = vsel %vm303_vm3, 0.0, %v300_v55  ;;  %v324_v30 = vsel %vm320_vm5, 0.0, %v317_v54 }
  0xbd   : > { %v310_v31 = vsel %vm1205_vm9, %v307_v19, 0.0  ;;  %v327_v38 = vmul.f32 %v326_v10, %v324_v30 }
  0xbe   : > { %v314_v39 = vmul.f32 %v313_v11, %v310_v31 }
  0xc0   : > { %v329_v51 = vadd.f32 %v327_v38, %v314_v39 }
  0xc3   : > { %v319_v57 = vpop.permute.xlu1 %318  ;;  %v302_v58 = vpop.permute.xlu0 %301 }
  0xc4   : > { %v1171_v61 = vpop.permute.xlu2 %411  ;;  %v304_v4 = vsel %vm303_vm3, %v300_v55, %v302_v58  ;;  %v321_v7 = vsel %vm320_vm5, %v317_v54, %v319_v57  ;;  %v391_v55 = vmul.f32 %v389_v44, %v387_v45  ;;  %v509_v45 = vstv %s1285_s30 }
  0xc5   : > { %v311_v8 = vsel %vm1177_vm4, %v304_v4, 0.0  ;;  %v328_v14 = vmul.f32 %v326_v10, %v321_v7  ;;  %v348_v7 = vadd.f32 %v346_v49, %v329_v51 }
  0xc6   : > { %v315_v15 = vmul.f32 %v313_v11, %v311_v8  ;;  %v371_v8 = vperm.slane %v1229_v29, 0 }
  0xc8   : > { %v330_v26 = vadd.f32 %v328_v14, %v315_v15  ;;  %v438_v14 = vstv %s1251_s27  ;;  %s641_s27 = sshll.u32 %s191_s26, 4  ;;  %s642_s27 = int_to_ptr.vmem [resolvable:$true] %s641_s27 }
  0xca   : > { %v349_v36 = vadd.f32 %v347_v32, %v330_v26 }
  0xcb   : > { %v353_v62 = vpop.permute.xlu1 %352  ;;  %v351_v63 = vpop.permute.xlu0 %350 }
  0xcc   : > { %v1192_v6 = vpop.permute.xlu2 %448  ;;  %v355_v16 = vsel %vm354_vm6, %v351_v63, %v353_v62  ;;  %v358_v40 = vsel %vm354_vm6, 0.0, %v351_v63 }
  0xcd   : > { %v360_v22 = vsel %vm1177_vm4, %v355_v16, 0.0  ;;  %v359_v50 = vsel %vm1205_vm9, %v358_v40, 0.0  ;;  %v487_v40 = vstv %s1275_s24  ;;  %s926_s24 = scalar_lea.hbm %s925_s19, 2 }
  0xce   : > { %v364_v33 = vmul.f32 %v362_v21, %v360_v22  ;;  %v363_v58 = vmul.f32 %v362_v21, %v359_v50  ;;  %p927_p1 = scmp.ne.s32.totalorder %s925_s19, %s926_s24 }
  0xd0   : > { %v366_v42 = vadd.f32 %v364_v33, %v349_v36  ;;  %v365_v11 = vadd.f32 %v363_v58, %v348_v7  ;;  %v529_v7 = vstv %s1301_s4  ;;  %p928_p2 = pnand %p927_p1, %p1102_p9  ;;  %s930_s4 = scalar_lea.hbm %s1406_s2, 4 }
  0xd1   : > { %p932_p11 = scmp.lt.s32.totalorder %s930_s4, %s926_s24 }
  0xd2   : > { %v376_v57 = vadd.f32 %v372_v41, %v366_v42  ;;  %v375_v25 = vadd.f32 %v371_v8, %v365_v11  ;;  %v503_v41 = vstv %s1283_s28  ;;  %p929_p4 = pneg %p928_p2 }
  0xd3   : > { %v1186_v1 = vpop.permute.xlu1 %396  ;;  %v1188_v5 = vpop.permute.xlu0 %377  ;;  %p933_p12 = por %p932_p11, %p931_p8 }
  0xd4   : > { %v1236_v34 = vpop.permute.xlu2 %476  ;;  %v402_v43 = vsel %vm398_vm12, %v1186_v1, 0.0  ;;  %v382_v59 = vsel %vm381_vm11, %v1188_v5, %v1166_v53  ;;  %v393_v9 = vadd.f32 %v391_v55, %v376_v57  ;;  %v399_v13 = vsel %vm398_vm12, %v1168_v56, %v1186_v1 }
  0xd5   : > { %v404_v54 = vsel %vm1177_vm4, %v402_v43, 0.0  ;;  %v386_v53 = vsel %vm1223_vm10, %v382_v59, 0.0  ;;  %v403_v56 = vsel %vm1205_vm9, %v399_v13, 0.0  ;;  %p934_p13 = pnand %p933_p12, %p929_p4 }
  0xd6   : > { %v408_v63 = vmul.f32 %v406_v52, %v404_v54  ;;  %v407_v32 = vmul.f32 %v406_v52, %v403_v56 }
  0xd8   : > { %v410_v19 = vadd.f32 %v408_v63, %v393_v9 }
  0xdb   : > { %v1218_v23 = vpop.permute.xlu1 %428  ;;  %v1220_v24 = vpop.permute.xlu0 %413 }
  0xdc   : > { %v419_v62 = vsel %vm415_vm13, %v1220_v24, 0.0  ;;  %v434_v0 = vsel %vm430_vm14, %v1218_v23, 0.0  ;;  %v495_v4 = vpop.permute.xlu2 %494  ;;  %v416_v30 = vsel %vm415_vm13, %v1171_v61, %v1220_v24 }
  0xdd   : > { %v423_v5 = vmul.f32 %v421_v60, %v419_v62  ;;  %v436_v15 = vsel %vm1199_vm8, %v434_v0, 0.0  ;;  %v483_v0 = vsel %vm335_vm7, 0.0, %v1236_v34 }
  0xde   : > { %v440_v1 = vmul.f32 %v438_v14, %v436_v15  ;;  %v484_v11 = vsel %vm1223_vm10, %v483_v0, 0.0 }
  0xdf   : > { %v425_v22 = vadd.f32 %v423_v5, %v410_v19  ;;  %v545_v19 = vstv %s1318_s5 }
  0xe1   : > { %v442_v35 = vadd.f32 %v440_v1, %v425_v22 }
  0xe3   : > { %v447_v46 = vpop.permute.xlu1 %446  ;;  %v427_v47 = vpop.permute.xlu0 %426 }
  0xe4   : > { %v450_v10 = vsel %vm303_vm3, %v447_v46, %v1192_v6  ;;  %v390_v6 = vmul.f32 %v389_v44, %v386_v53  ;;  %v431_v26 = vsel %vm430_vm14, %v427_v47, %v1218_v23  ;;  %v1303_v38 = vpop.permute.xlu2 %536  ;;  %v422_v23 = vmul.f32 %v421_v60, %v416_v30 }
  0xe5   : > { %v455_v21 = vsel %vm1177_vm4, %v450_v10, 0.0  ;;  %v435_v36 = vsel %vm1223_vm10, %v431_v26, 0.0  ;;  %v453_v39 = vsel %vm303_vm3, 0.0, %v447_v46  ;;  %v510_v60 = vmul.f32 %v509_v45, %v1158_v48 }
  0xe6   : > { %v459_v31 = vmul.f32 %v457_v20, %v455_v21  ;;  %v392_v33 = vadd.f32 %v390_v6, %v375_v25  ;;  %v439_v49 = vmul.f32 %v438_v14, %v435_v36  ;;  %v454_v51 = vsel %vm1205_vm9, %v453_v39, 0.0 }
  0xe7   : > { %v458_v62 = vmul.f32 %v457_v20, %v454_v51  ;;  %v541_v48 = vsel %vm398_vm12, %v1303_v38, 0.0  ;;  %v488_v21 = vmul.f32 %v487_v40, %v484_v11  ;;  %v575_v30 = vstv %s1327_s7 }
  0xe8   : > { %v461_v24 = vadd.f32 %v459_v31, %v442_v35  ;;  %v409_v47 = vadd.f32 %v407_v32, %v392_v33  ;;  %v543_v6 = vsel %vm1177_vm4, %v541_v48, 0.0  ;;  %v512_v35 = vperm.slane %v510_v60, 0 }
  0xea   : > { %v424_v55 = vadd.f32 %v422_v23, %v409_v47 }
  0xeb   : > { %v465_v16 = vpop.permute.xlu1 %464  ;;  %v463_v18 = vpop.permute.xlu0 %462 }
  0xec   : > { %v466_v29 = vsel %vm320_vm5, %v463_v18, %v465_v16  ;;  %v469_v58 = vsel %vm320_vm5, 0.0, %v463_v18  ;;  %v441_v63 = vadd.f32 %v439_v49, %v424_v55  ;;  %v567_v13 = vpop.permute.xlu2 %566 }
  0xed   : > { %v473_v37 = vmul.f32 %v471_v28, %v466_v29  ;;  %v472_v8 = vmul.f32 %v471_v28, %v469_v58  ;;  %v571_v1 = vsel %vm430_vm14, %v567_v13, 0.0  ;;  %v547_v28 = vmul.f32 %v545_v19, %v543_v6 }
  0xee   : > { %v460_v14 = vadd.f32 %v458_v62, %v441_v63  ;;  %v559_v29 = vstv %s1324_s6  ;;  %v573_v31 = vsel %vm1199_vm8, %v571_v1, 0.0 }
  0xef   : > { %v475_v52 = vadd.f32 %v473_v37, %v461_v24 }
  0xf0   : > { %v474_v20 = vadd.f32 %v472_v8, %v460_v14 }
  0xf2   : > { %v490_v3 = vadd.f32 %v488_v21, %v474_v20 }
  0xf3   : > { %v493_v42 = vpop.permute.xlu1 %492  ;;  %v479_v61 = vpop.permute.xlu0 %478 }
  0xf4   : > { %v480_v43 = vsel %vm335_vm7, %v1236_v34, %v479_v61  ;;  %v496_v44 = vsel %vm354_vm6, %v493_v42, %v495_v4  ;;  %v513_v4 = vperm.slane %v510_v60, 1  ;;  %v499_v9 = vsel %vm354_vm6, 0.0, %v493_v42 }
  0xf5   : > { %v485_v50 = vsel %vm1199_vm8, %v480_v43, 0.0  ;;  %v501_v46 = vsel %vm1177_vm4, %v496_v44, 0.0  ;;  %v500_v16 = vsel %vm1205_vm9, %v499_v9, 0.0  ;;  %v577_v42 = vmul.f32 %v575_v30, %v573_v31 }
  0xf6   : > { %v489_v54 = vmul.f32 %v487_v40, %v485_v50  ;;  %v505_v57 = vmul.f32 %v503_v41, %v501_v46  ;;  %v504_v22 = vmul.f32 %v503_v41, %v500_v16  ;;  %v581_v43 = vstv %s1343_s8 }
  0xf8   : > { %v491_v59 = vadd.f32 %v489_v54, %v475_v52  ;;  %v506_v39 = vadd.f32 %v504_v22, %v490_v3 }
  0xfa   : > { %v507_v53 = vadd.f32 %v505_v57, %v491_v59  ;;  %v516_v44 = vadd.f32 %v512_v35, %v506_v39 }
  0xfb   : > { %v519_v5 = vpop.permute.xlu1 %518  ;;  %v521_v10 = vpop.permute.xlu0 %520 }
  0xfc   : > { %v525_v34 = vsel %vm381_vm11, %v521_v10, 0.0  ;;  %v517_v56 = vadd.f32 %v513_v4, %v507_v53  ;;  %v522_v25 = vsel %vm381_vm11, %v519_v5, %v521_v10 }
  0xfd   : > { %v527_v15 = vsel %vm1199_vm8, %v525_v34, 0.0  ;;  %v526_v36 = vsel %vm1223_vm10, %v522_v25, 0.0 }
  0xfe   : > { %v531_v18 = vmul.f32 %v529_v7, %v527_v15  ;;  %v530_v61 = vmul.f32 %v529_v7, %v526_v36 }
 0x100   : > { %v533_v26 = vadd.f32 %v531_v18, %v517_v56  ;;  %v532_v49 = vadd.f32 %v530_v61, %v516_v44 }
 0x102   : > { %v549_v40 = vadd.f32 %v547_v28, %v533_v26 }
 0x103   : > { %v553_v32 = vpop.permute.xlu1 %552  ;;  %v535_v33 = vpop.permute.xlu0 %534 }
 0x104   : > { %v557_v37 = vsel %vm415_vm13, %v553_v32, 0.0  ;;  %v538_v23 = vsel %vm398_vm12, %v535_v33, %v1303_v38 }
 0x105   : > { %v561_v41 = vmul.f32 %v559_v29, %v557_v37  ;;  %v542_v12 = vsel %vm1205_vm9, %v538_v23, 0.0 }
 0x106   : > { %v546_v45 = vmul.f32 %v545_v19, %v542_v12 }
 0x107   : > { %v563_v24 = vadd.f32 %v561_v41, %v549_v40 }
 0x108   : > { %v548_v54 = vadd.f32 %v546_v45, %v532_v49 }
 0x109   : > { %v579_v47 = vadd.f32 %v577_v42, %v563_v24 }
 0x10b   : > { %v583_v50 = vadd.f32 %v581_v43, %v579_v47  ;;  %v565_v46 = vpop.permute.xlu1 %564  ;;  %v551_v51 = vpop.permute.xlu0 %550 }
 0x10c   : > { %v568_v52 = vsel %vm430_vm14, %v565_v46, %v567_v13  ;;  %v554_v38 = vsel %vm415_vm13, %v551_v51, %v553_v32 }
 0x10d   : > { %v768_v55 = vmul.f32 -1.442695, %v583_v50  ;;  %v572_v17 = vsel %vm1223_vm10, %v568_v52, 0.0  ;;  %v560_v57 = vmul.f32 %v559_v29, %v554_v38 }
 0x10e   : > { %v576_v58 = vmul.f32 %v575_v30, %v572_v17 }
 0x10f   : > { %857 = vpow2.f32 %v768_v55  ;;  %v562_v59 = vadd.f32 %v560_v57, %v548_v54 }
 0x111   : > { %v578_v60 = vadd.f32 %v576_v58, %v562_v59 }
 0x113   : > { %v582_v62 = vadd.f32 %v581_v43, %v578_v60 }
 0x115   : > { %v858_v63 = vpop.eup %857  ;;  %v767_v0 = vmul.f32 -1.442695, %v582_v62 }
 0x116   : > { %v591_v4 = vadd.f32 1.0, %v858_v63 }
 0x117   : > { %859 = vpow2.f32 %v767_v0 }
 0x118   : > { %861 = vrcp.f32 %v591_v4  ;;  %v618_v11 = vand.u32 2147483648, %v591_v4  ;;  %vm612_vm1 = vweird.f32 %v591_v4  ;;  %v616_v13 = vand.u32 2147483647, %v591_v4 }
 0x11a   : > { %v619_v18 = vor.u32 1.1754944e-38, %v618_v11  ;;  %vm617_vm5 = vcmp.eq.f32.partialorder %v616_v13, 8.507059e+37 }
 0x11d   : > { %v860_v7 = vpop.eup %859 }
 0x11e   : > { %v862_v8 = vpop.eup %861  ;;  %v590_v9 = vadd.f32 1.0, %v860_v7 }
 0x11f   : > { %v608_v53 = vmul.f32 %v862_v8, %v591_v4  ;;  %vm613_vm15 = vweird.f32 %v862_v8 }
 0x120   : > { %863 = vrcp.f32 %v590_v9  ;;  %vm614_vm3 = vmor %vm612_vm1, %vm613_vm15  ;;  %v603_v16 = vand.u32 2147483648, %v590_v9  ;;  %v601_v6 = vand.u32 2147483647, %v590_v9  ;;  %vm597_vm6 = vweird.f32 %v590_v9 }
 0x121   : > { %v609_v27 = vsub.f32 1.0, %v608_v53 }
 0x122   : > { %v604_v56 = vor.u32 1.1754944e-38, %v603_v16  ;;  %vm602_vm8 = vcmp.eq.f32.partialorder %v601_v6, 8.507059e+37 }
 0x123   : > { %v610_v5 = vmul.f32 %v862_v8, %v609_v27 }
 0x125   : > { %v611_v10 = vadd.f32 %v862_v8, %v610_v5 }
 0x126   : > { %v864_v48 = vpop.eup %863 }
 0x127   : > { %v593_v34 = vmul.f32 %v864_v48, %v590_v9  ;;  %v615_v15 = vsel %vm614_vm3, %v862_v8, %v611_v10  ;;  %vm598_vm4 = vweird.f32 %v864_v48 }
 0x128   : > { %v620_v20 = vsel %vm617_vm5, %v619_v18, %v615_v15  ;;  %vm599_vm7 = vmor %vm597_vm6, %vm598_vm4 }
 0x129   : > { %v594_v14 = vsub.f32 1.0, %v593_v34  ;;  %v624_v22 = vrot.slane %v620_v20, 7 }
 0x12b   : > { %v595_v19 = vmul.f32 %v864_v48, %v594_v14 }
 0x12d   : > { %v596_v21 = vadd.f32 %v864_v48, %v595_v19 }
 0x12f   : > { %v600_v1 = vsel %vm599_vm7, %v864_v48, %v596_v21 }
 0x130   : > { %v605_v25 = vsel %vm602_vm8, %v604_v56, %v600_v1 }
 0x131   : > { %v625_v26 = vsel %vm228_vm2, %v605_v25, %v624_v22 }
 0x132   : > { %627 = vst.msk [vmem:[%s191_s26] sm:$0x3] %vm1132_vm0, %v625_v26 }
 0x133   : > { %937 = shalt.err (!%p934_p13)
}
 0x134   : > { %780 = dma.vmem_to_hbm [thread:$0]  (%p1102_p9), %s642_s27, 32, %s644_s12, %s629_s17  }
 0x135 PF: > { %s655_s22 = sand.u32 1, %s976_s9   ;;  %p1423_p0 = scmp.ge.s32.totalorder %s996_s14, 2 }
 0x136   : > { %s656_s7 = scalar_lea.sflag [#allocation6], %s655_s22 }
 0x137   : > { %p791_p3 = pnand %p1423_p0, %p1073_p6 }
 0x139   : > { %p792_p5 = pneg %p791_p3 }
 0x13b   : > { %971 = dma.done.wait (%p792_p5), %s656_s7, 32  }
 0x13c   : > { %973 = vsyncadd (%p792_p5), %s656_s7, 4294967264  ;;  %s19_s14 = sadd.s32 1, %s996_s14   ;;  %s1424_s9 = smov %s980_s10 }
 0x13d   : > { %p16_p7 = scmp.ge.s32.totalorder %s19_s14, 4   ;;  %s1425_s10 = smov %s984_s11 }
 0x13e   : > { %s1426_s11 = smov %s1108_s3  ;;  %s1427_s12 = smov %s992_s13 }
 0x13f   : > { %s1428_s13 = smov %s1430_s25  ;;  %18 = sbr.rel (!%p16_p7) target bundleno = 7 (0x7), region = 86 }
 0x144   :  { %662 = vsyncpa [#allocation5], 1 }
 0x145   :  { %664 = vsyncpa [#allocation5 + $0x1], 1 }
 0x146   :  { %665 = vsyncpa [#allocation6], 1 }
 0x147   :  { %667 = vsyncpa [#allocation6 + $0x1], 1 }
 0x148   :  { %668 = vsyncpa [#allocation7], 1 }
 0x149   :  { %670 = vsyncpa [#allocation7 + $0x1], 1 }

</bundles_post_ra>
